<compile_context>
chip_gen: v6e
topology: v6e:2x2x1
jax: 0.10.0
libtpu: 0.0.40
codegen_flags: <defaults>
</compile_context>

<pallas_src>
import math
from functools import partial

import numpy as np

import jax
import jax.numpy as jnp
from jax import lax
from jax.experimental import pallas as pl
from jax.experimental.pallas import tpu as pltpu


# ---------------------------------------------------------------------------
# Helpers
# ---------------------------------------------------------------------------

def _pick_vmem_limit_bytes():
    """Per-generation scoped-VMEM budget: ~75% of physical, capped at 100 MiB.

    v5e/v6e (128 MiB physical) -> 96 MiB; v7x (64 MiB per core) -> 48 MiB.
    Falls back to a conservative 48 MiB if the hardware query is unavailable.
    """
    try:
        cap = int(pltpu.get_tpu_info().vmem_capacity_bytes)
    except Exception:
        cap = 64 * 1024 * 1024
    return max(32 * 1024 * 1024, min((cap * 3) // 4, 100 * 1024 * 1024))


def _choose_block(dim, max_blk, alignments=(128, 8)):
    """Largest tile <= max_blk dividing `dim`, preferring 128-aligned tiles
    (lane-dense stores / full MXU M-dim), then 8-aligned (sublane) tiles."""
    if dim <= max_blk:
        return dim
    for a in alignments:
        for cand in range((max_blk // a) * a, a - 1, -a):
            if cand > 0 and dim % cand == 0:
                return cand
    # No aligned divisor: a full-extent block is always legal.
    # TODO(synk): pad `dim` up to a 128-multiple for awkward sizes instead.
    return dim


# ---------------------------------------------------------------------------
# Kernel 1: bias-add Linear over flattened rows (K / V projections)
# ---------------------------------------------------------------------------

def _linear_kernel(x_ref, w_ref, b_ref, o_ref, *, compute_dtype):
    acc = jnp.dot(x_ref[...].astype(compute_dtype), w_ref[...],
                  preferred_element_type=jnp.float32) + b_ref[...]
    o_ref[...] = acc.astype(o_ref.dtype)


def _linear(x2d, w, b, *, compute_dtype, vmem_limit, max_block_rows=512):
    """y = x @ W + b over (M, D_in) rows, output stored in compute dtype."""
    m_rows, d_in = x2d.shape
    d_out = w.shape[1]
    blk_m = _choose_block(m_rows, max_block_rows)
    const = pl.Buffered(1)      # grid-invariant weight / bias: single-buffer
    return pl.pallas_call(
        partial(_linear_kernel, compute_dtype=compute_dtype),
        out_shape=jax.ShapeDtypeStruct((m_rows, d_out), compute_dtype),
        grid_spec=pltpu.PrefetchScalarGridSpec(
            num_scalar_prefetch=0,
            grid=(m_rows // blk_m,),
            in_specs=[pl.BlockSpec((blk_m, d_in), lambda i: (i, 0)),
                      pl.BlockSpec((d_in, d_out), lambda i: (0, 0),
                                   pipeline_mode=const),
                      pl.BlockSpec((1, d_out), lambda i: (0, 0),
                                   pipeline_mode=const)],
            out_specs=pl.BlockSpec((blk_m, d_out), lambda i: (i, 0)),
        ),
        compiler_params=pltpu.CompilerParams(
            dimension_semantics=("parallel",),
            vmem_limit_bytes=vmem_limit,
        ),
    )(x2d, w, b)


# ---------------------------------------------------------------------------
# Kernel 2: fused Q-projection + multi-head attention + output projection
# ---------------------------------------------------------------------------

def _mha_kernel(q_ref, k_ref, v_ref, mask_ref,
                wq_ref, bq_ref, wp_ref, bp_ref,
                out_ref,
                *, n_head, head_dim, compute_dtype):
    f32 = jnp.float32
    is_f32 = np.dtype(compute_dtype) == np.dtype(jnp.float32)

    # --- Q projection for this (blk_q, D) query tile; the score scale is
    #     folded into q once (hoisted out of the head loop).  The bf16 path
    #     rounds the *scaled* q to bf16 (reference scales the f32 scores) —
    #     a deliberate, documented deviation well within tolerance. ---------
    qh = jnp.dot(q_ref[...].astype(compute_dtype), wq_ref[...],
                 preferred_element_type=f32) + bq_ref[...]
    scale = 1.0 / (math.sqrt(float(head_dim)) + 1e-8)
    qh = (qh * scale).astype(compute_dtype)                    # (tq, D)

    kh = k_ref[...]                                            # (S, D)
    vh = v_ref[...]                                            # (S, D)
    # Mask arrives compressed (compute dtype); expand to additive -1e9 once.
    neg_mask = mask_ref[...].astype(f32) * (-1e9)              # (tq, S)

    tq = qh.shape[0]
    kv_len = kh.shape[0]

    # head_dim % 128 == 0: per-head ctx tiles are lane-aligned — concat them
    # and run ONE full-D output projection (best MXU utilisation).  Otherwise
    # accumulate per-head partial projections (lane-dense, no masked stores).
    fused_proj = (head_dim % 128 == 0)
    # Small heads (<= 128): the kernel is EUP/XLU-limited, so move the softmax
    # row-sum onto the MXU (p @ ones).  Big heads: keep the XLU reduction.
    mxu_rowsum = (head_dim <= 128)
    ones_col = jnp.ones((kv_len, 1), compute_dtype) if mxu_rowsum else None

    ctx_parts = []
    out_acc = jnp.zeros((tq, n_head * head_dim), f32)

    # Static unrolled loop over heads (n_head is small and compile-time).
    for h in range(n_head):
        sl = slice(h * head_dim, (h + 1) * head_dim)
        q_h = qh[:, sl]                                        # (tq, hd)
        k_h = kh[:, sl]                                        # (S,  hd)
        v_h = vh[:, sl]                                        # (S,  hd)

        # q @ k^T as an (m,k)x(n,k) contraction — canonical flash pattern,
        # feeds the MXU without an explicit XLU transpose.
        s = lax.dot_general(q_h, k_h, (((1,), (1,)), ((), ())),
                            preferred_element_type=f32)        # (tq, S)
        s = s + neg_mask

        # Numerically-stable softmax: f32 row max (XLU); exp in compute dtype
        # (bf16 EUP on v6e/v7x, auto-widened on v5e); normalization deferred.
        s = s - jnp.max(s, axis=-1, keepdims=True)
        p = jnp.exp(s.astype(compute_dtype))                   # (tq, S)

        ctx = jnp.dot(p, v_h, preferred_element_type=f32)      # (tq, hd)
        if mxu_rowsum:
            denom = jnp.dot(p, ones_col, preferred_element_type=f32)
        else:
            denom = jnp.sum(p.astype(f32), axis=-1, keepdims=True)
        # Exact reciprocal for the f32 path; EUP approx for the bf16 path.
        ctx = ctx * pl.reciprocal(denom, approx=not is_f32)

        if fused_proj:
            ctx_parts.append(ctx.astype(compute_dtype))
        else:
            # Lane-dense accumulation of the output projection: every head
            # adds a full-width (tq, D) contribution.
            out_acc = out_acc + jnp.dot(ctx.astype(compute_dtype),
                                        wp_ref[sl, :],
                                        preferred_element_type=f32)

    if fused_proj:
        ctx_full = jnp.concatenate(ctx_parts, axis=-1)         # (tq, D)
        out_acc = jnp.dot(ctx_full, wp_ref[...], preferred_element_type=f32)

    out_ref[...] = (out_acc + bp_ref[...]).astype(out_ref.dtype)


def multihead_attention(q, k, v, mask, params, n_head, *,
                        compute_dtype=jnp.bfloat16, max_block_q=128):
    """Multi-head attention forward (eval mode, dropout = identity)."""
    B, S, D = q.shape
    assert D % n_head == 0, "model_dim must be divisible by n_head"
    head_dim = D // n_head
    wq, bq, wk, bk, wv, bv, wp, bp = params

    vmem_limit = _pick_vmem_limit_bytes()

    # Low-precision weights for the MXU; biases stay f32 (added onto the f32
    # accumulators inside the kernels).
    wq, wk, wv, wp = (w.astype(compute_dtype) for w in (wq, wk, wv, wp))
    bq, bk, bv, bp = (jnp.asarray(b, jnp.float32).reshape(1, D)
                      for b in (bq, bk, bv, bp))

    # K / V projections externalized into their own Pallas matmuls over the
    # flattened (B*S, D) rows: long MXU M-dim, no per-batch projection bubble,
    # no (S, D) VMEM scratch in the attention kernel, and the attention kernel
    # streams compute-dtype K/V (half the HBM bytes of f32 in the bf16 path).
    kproj = _linear(k.reshape(B * S, D), wk, bk,
                    compute_dtype=compute_dtype, vmem_limit=vmem_limit)
    vproj = _linear(v.reshape(B * S, D), wv, bv,
                    compute_dtype=compute_dtype, vmem_limit=vmem_limit)
    kproj = kproj.reshape(B, S, D)
    vproj = vproj.reshape(B, S, D)

    # Compress the (B, S, S) mask HBM stream; 0/1 masks are exact in bf16 and
    # the kernel only uses it as `mask * -1e9`.
    mask = mask.astype(compute_dtype)

    blk_q = _choose_block(S, max_block_q)   # prefer 128-aligned query tiles
    n_q = S // blk_q

    kernel = partial(_mha_kernel, n_head=n_head, head_dim=head_dim,
                     compute_dtype=compute_dtype)

    const = pl.Buffered(1)   # grid-invariant weights/biases: single-buffer
    q_spec = pl.BlockSpec((None, blk_q, D), lambda b, i: (b, i, 0))
    kv_spec = pl.BlockSpec((None, S, D), lambda b, i: (b, 0, 0))
    mask_spec = pl.BlockSpec((None, blk_q, S), lambda b, i: (b, i, 0))
    w_spec = pl.BlockSpec((D, D), lambda b, i: (0, 0), pipeline_mode=const)
    bias_spec = pl.BlockSpec((1, D), lambda b, i: (0, 0), pipeline_mode=const)
    out_spec = pl.BlockSpec((None, blk_q, D), lambda b, i: (b, i, 0))

    return pl.pallas_call(
        kernel,
        out_shape=jax.ShapeDtypeStruct((B, S, D), q.dtype),
        grid_spec=pltpu.PrefetchScalarGridSpec(
            num_scalar_prefetch=0,
            grid=(B, n_q),
            in_specs=[q_spec, kv_spec, kv_spec, mask_spec,
                      w_spec, bias_spec, w_spec, bias_spec],
            out_specs=out_spec,
        ),
        compiler_params=pltpu.CompilerParams(
            # No cross-iteration carried state: both grid axes are independent
            # so megacore may shard either one.
            dimension_semantics=("parallel", "parallel"),
            vmem_limit_bytes=vmem_limit,
        ),
    )(q, kproj, vproj, mask, wq, bq, wp, bp)


# ---------------------------------------------------------------------------
# Pure-JAX reference (matches the PyTorch forward, eval mode)
# ---------------------------------------------------------------------------

def multihead_reference(q, k, v, mask, params, n_head):
    B, S, D = q.shape
    hd = D // n_head
    wq, bq, wk, bk, wv, bv, wp, bp = params

    def split(x):
        return x.reshape(B, S, n_head, hd).transpose(0, 2, 1, 3)  # (B, H, S, hd)

    _q = split(q @ wq + bq)
    _k = split(k @ wk + bk)
    _v = split(v @ wv + bv)
    score = jnp.einsum("bhqd,bhkd->bhqk", _q, _k) / (jnp.sqrt(jnp.float32(hd)) + 1e-8)
    score = score + mask[:, None, :, :] * (-1e9)
    score = jax.nn.softmax(score, axis=-1)
    ctx = jnp.einsum("bhqk,bhkd->bhqd", score, _v)
    ctx = ctx.transpose(0, 2, 1, 3).reshape(B, S, D)
    return ctx @ wp + bp


if __name__ == "__main__":
    B, S, D = 2, 8, 32
    n_head = 4

    key = jax.random.PRNGKey(0)
    ks = jax.random.split(key, 12)

    q = jax.random.normal(ks[0], (B, S, D), dtype=jnp.float32)
    k = jax.random.normal(ks[1], (B, S, D), dtype=jnp.float32)
    v = jax.random.normal(ks[2], (B, S, D), dtype=jnp.float32)

    # Causal-style mask: 1.0 where attention is disallowed (j > i), else 0.0.
    row = jnp.arange(S)[:, None]
    col = jnp.arange(S)[None, :]
    mask = jnp.broadcast_to((col > row).astype(jnp.float32), (B, S, S))

    scale = 0.05
    wq = scale * jax.random.normal(ks[3], (D, D), dtype=jnp.float32)
    bq = scale * jax.random.normal(ks[4], (1, D), dtype=jnp.float32)
    wk = scale * jax.random.normal(ks[5], (D, D), dtype=jnp.float32)
    bk = scale * jax.random.normal(ks[6], (1, D), dtype=jnp.float32)
    wv = scale * jax.random.normal(ks[7], (D, D), dtype=jnp.float32)
    bv = scale * jax.random.normal(ks[8], (1, D), dtype=jnp.float32)
    wp = scale * jax.random.normal(ks[9], (D, D), dtype=jnp.float32)
    bp = scale * jax.random.normal(ks[10], (1, D), dtype=jnp.float32)
    params = (wq, bq, wk, bk, wv, bv, wp, bp)

    ref = multihead_reference(q, k, v, mask, params, n_head)

    # Default (performance) path: bf16 MXU inputs, f32 accumulation / softmax max.
    out_bf16 = multihead_attention(q, k, v, mask, params, n_head)
    out_bf16 = jax.block_until_ready(out_bf16)
    assert out_bf16.shape == (B, S, D)
    assert jnp.allclose(out_bf16, ref, rtol=2e-2, atol=2e-2), (
        "bf16-compute mismatch vs reference, max abs err = "
        f"{float(jnp.max(jnp.abs(out_bf16 - ref)))}")

    # Full-precision compute path (tight check of kernel structure; exact
    # reciprocal is used here, approx reciprocal only in the bf16 path).
    out_f32 = multihead_attention(q, k, v, mask, params, n_head,
                                  compute_dtype=jnp.float32)
    out_f32 = jax.block_until_ready(out_f32)
    assert jnp.allclose(out_f32, ref, rtol=5e-3, atol=5e-3), (
        "f32-compute mismatch vs reference, max abs err = "
        f"{float(jnp.max(jnp.abs(out_f32 - ref)))}")

    print("KERNEL_OK")
</pallas_src>

<mosaic_0001>
module attributes {stable_mosaic.version = 11 : i64} {
  func.func @_linear_kernel(%arg0: i32, %arg1: memref<16x32xf32, #tpu.memory_space<vmem>>, %arg2: memref<32x32xbf16, #tpu.memory_space<vmem>>, %arg3: memref<1x32xf32, #tpu.memory_space<vmem>>, %arg4: memref<16x32xbf16, #tpu.memory_space<vmem>>) attributes {dimension_semantics = [#tpu.dimension_semantics<parallel>], iteration_bounds = array<i64: 1>, scalar_prefetch = 0 : i64, scratch_operands = 0 : i64, tpu.core_type = #tpu.core_type<tc>, window_params = [{transform_indices = @transform_0, window_bounds = array<i64: 16, 32>}, {pipeline_mode = #tpu.pipeline_mode<synchronous>, transform_indices = @transform_1, window_bounds = array<i64: 32, 32>}, {pipeline_mode = #tpu.pipeline_mode<synchronous>, transform_indices = @transform_2, window_bounds = array<i64: 1, 32>}, {transform_indices = @transform_3, window_bounds = array<i64: 16, 32>}]} {
    %c0 = arith.constant 0 : index
    %c0_0 = arith.constant 0 : index
    %0 = vector.load %arg1[%c0, %c0_0] : memref<16x32xf32, #tpu.memory_space<vmem>>, vector<16x32xf32>
    %1 = arith.truncf %0 : vector<16x32xf32> to vector<16x32xbf16>
    %c0_1 = arith.constant 0 : index
    %c0_2 = arith.constant 0 : index
    %2 = vector.load %arg2[%c0_1, %c0_2] : memref<32x32xbf16, #tpu.memory_space<vmem>>, vector<32x32xbf16>
    %cst = arith.constant dense<0.000000e+00> : vector<16x32xf32>
    %3 = tpu.matmul %1, %2, %cst {dimension_numbers = #tpu.dot_dimension_numbers<[1], [0], [0], [1], [0, 0, 1, 1], [], []>} : vector<16x32xbf16>, vector<32x32xbf16>, vector<16x32xf32> -> vector<16x32xf32>
    %c0_3 = arith.constant 0 : index
    %c0_4 = arith.constant 0 : index
    %4 = vector.load %arg3[%c0_3, %c0_4] : memref<1x32xf32, #tpu.memory_space<vmem>>, vector<1x32xf32>
    %5 = vector.broadcast %4 : vector<1x32xf32> to vector<16x32xf32>
    %6 = arith.addf %3, %5 : vector<16x32xf32>
    %7 = arith.truncf %6 : vector<16x32xf32> to vector<16x32xbf16>
    %c0_5 = arith.constant 0 : index
    %c0_6 = arith.constant 0 : index
    %8 = vector.load %arg4[%c0_5, %c0_6] : memref<16x32xbf16, #tpu.memory_space<vmem>>, vector<16x32xbf16>
    tpu.vector_store %arg4[%c0_5, %c0_6], %7 {strides = array<i32>} : memref<16x32xbf16, #tpu.memory_space<vmem>>, vector<16x32xbf16>,
    return
  }
  func.func @transform_0(%arg0: i32) -> (i32, i32) {
    %c0_i32 = arith.constant 0 : i32
    %c0_i32_0 = arith.constant 0 : i32
    return %arg0, %c0_i32 : i32, i32
  }
  func.func @transform_1(%arg0: i32) -> (i32, i32) {
    %c0_i32 = arith.constant 0 : i32
    %c0_i32_0 = arith.constant 0 : i32
    %c0_i32_1 = arith.constant 0 : i32
    return %c0_i32, %c0_i32_0 : i32, i32
  }
  func.func @transform_2(%arg0: i32) -> (i32, i32) {
    %c0_i32 = arith.constant 0 : i32
    %c0_i32_0 = arith.constant 0 : i32
    %c0_i32_1 = arith.constant 0 : i32
    return %c0_i32, %c0_i32_0 : i32, i32
  }
  func.func @transform_3(%arg0: i32) -> (i32, i32) {
    %c0_i32 = arith.constant 0 : i32
    %c0_i32_0 = arith.constant 0 : i32
    return %arg0, %c0_i32 : i32, i32
  }
}

</mosaic_0001>

<bundles_post_ra>
// kernel: tpu_custom_call.1
= control target key start
LH: loop header
LB: loop body
LE: loop exit
PB: predicated region body
PF: predicated region fallthrough
CT: control target
= control target key end

     0   :  { %8 = vsyncpa [#allocation3], 0  ;;  %s287_s0 = inlined_call_operand.hbm [shape: f32[16,32], index: 0, kind: input, shape index: {}]   ;;  %s288_s1 = inlined_call_operand.hbm [shape: bf16[32,32], index: 1, kind: input, shape index: {}]   ;;  %s289_s2 = inlined_call_operand.vmem [shape: f32[1,32], index: 2, kind: input, shape index: {}]   ;;  %s290_s3 = inlined_call_operand.hbm [shape: bf16[16,32], index: 3, kind: output, shape index: {}]  }
   0x1   :  { %9 = vsyncpa [#allocation6], 0 }
   0x2   :  { %10 = vsyncpa [#allocation4], 0  ;;  %s240_s12 = smov [#allocation2]  }
   0x3   :  { %s16_s13 = sshll.u32 %s240_s12, 4  ;;  %s17_s13 = int_to_ptr.vmem [resolvable:$true] %s16_s13 }
   0x4   :  { %s182_s14 = scalar_lea.vmem %s17_s13, 256  ;;  %p187_p1 = scmp.lt.s32.totalorder %s17_s13, %s17_s13 }
   0x5   :  { %p183_p0 = scmp.ne.s32.totalorder %s17_s13, %s182_s14  ;;  %p188_p2 = scmp.lt.s32.totalorder %s182_s14, %s182_s14 }
   0x7   :  { %p189_p3 = por %p188_p2, %p187_p1 }
   0x9   :  { %p190_p4 = pnand %p189_p3, %p183_p0 }
   0xb   :  { %193 = shalt.err (!%p190_p4)
}
   0xc   :  { %s241_s15 = smov 128   ;;  %s242_s16 = smov 8  }
   0xd   :  { %22 = dma.hbm_to_vmem [thread:$0]  %s287_s0, 256, %s17_s13, [#allocation3], %s241_s15, %s241_s15, %s242_s16  }
   0xe   :  { %s243_s19 = smov [#allocation5]  }
   0xf   :  { %s28_s20 = sshll.u32 %s243_s19, 4  ;;  %s29_s20 = int_to_ptr.vmem [resolvable:$true] %s28_s20 }
  0x10   :  { %s202_s21 = scalar_lea.vmem %s29_s20, 256  ;;  %p207_p6 = scmp.lt.s32.totalorder %s29_s20, %s29_s20 }
  0x11   :  { %p203_p5 = scmp.ne.s32.totalorder %s29_s20, %s202_s21  ;;  %p208_p7 = scmp.lt.s32.totalorder %s202_s21, %s202_s21 }
  0x13   :  { %p209_p8 = por %p208_p7, %p207_p6 }
  0x15   :  { %p210_p9 = pnand %p209_p8, %p203_p5 }
  0x17   :  { %213 = shalt.err (!%p210_p9)
}
  0x18   :  { %s244_s22 = smov 64   ;;  %s245_s23 = smov 4  }
  0x19   :  { %34 = dma.hbm_to_vmem [thread:$0]  %s288_s1, 256, %s29_s20, [#allocation6], %s244_s22, %s244_s22, %s245_s23  }
  0x1a   :  { %234 = dma.done.wait [#allocation3], 256  }
  0x1b   :  { %235 = vsyncadd [#allocation3], 4294967040 }
  0x1c   :  { %236 = dma.done.wait [#allocation6], 256  }
  0x1d   :  { %237 = vsyncadd [#allocation6], 4294967040  ;;  %v246_v0 = vmov 0.0   ;;  %vm247_vm0 = vmmov 0   ;;  %v172_v1 = vld [vmem:[#allocation5 + $0x8] sm:$0xff]   ;;  %v173_v2 = vld [vmem:[#allocation5] sm:$0xff]  }
  0x1e   :  { %155 = vmatprep.subr.bf16.mxu0 %v246_v0  ;;  %159 = vmatprep.mubr.msk.bf16.mxu0 %vm247_vm0, %v246_v0  ;;  %v44_v3 = vld [vmem:[#allocation2] sm:$0xff]  ;;  %v45_v4 = vld [vmem:[#allocation2 + $0x8] sm:$0xff]  ;;  %vm70_vm1 = vcmask 261120   ;;  %vm123_vm2 = vcmask 257024   ;;  %s248_s26 = smov [#allocation7]  }
  0x1f   :  { %156 = vmatpush3.bf16.msra.mxu0 %v172_v1  ;;  %v46_v5 = vpack.c.bf16 %v45_v4, %v44_v3  ;;  %v144_v6 = vld [vmem:[%s289_s2] ss:$0 sm:$0xff]  ;;  %s131_s27 = sshll.u32 %s248_s26, 4  ;;  %s132_s27 = int_to_ptr.vmem [resolvable:$true] %s131_s27 }
  0x20   :  { %157 = vmatprep.subr.bf16.mxu0 %v246_v0  ;;  %s214_s28 = scalar_lea.vmem %s132_s27, 128  ;;  %p219_p11 = scmp.lt.s32.totalorder %s132_s27, %s132_s27 }
  0x21   :  { %p215_p10 = scmp.ne.s32.totalorder %s132_s27, %s214_s28  ;;  %p220_p12 = scmp.lt.s32.totalorder %s214_s28, %s214_s28 }
  0x23   :  { %158 = vmatpush3.bf16.msra.mxu0 %v173_v2  ;;  %p221_p13 = por %p220_p12, %p219_p11 }
  0x25   :  { %p222_p0 = pnand %p221_p13, %p215_p10 }
  0x26   :  { %160 = vmatmul.mubr.msk.bf16.vlgmr.msra.gmra.mxu0 %vm70_vm1, %v46_v5 }
  0xe6   :  { %v108_v7 = vpop.f32.mrf.mxu0 }
  0xe7   :  { %v109_v8 = vadd.f32 %v144_v6, %v108_v7 }
  0xe8   :  { %v161_v9 = vpop.f32.mrf.mxu0 }
  0xe9   :  { %v150_v10 = vpack.c.bf16 %v109_v8, %v109_v8 }
  0xea   :  { %v111_v11 = vpop.f32.mrf.mxu0 }
  0xeb   :  { %v112_v12 = vadd.f32 %v144_v6, %v111_v11  ;;  %124 = vst.msk [vmem:[#allocation7] sm:$0xf] %vm123_vm2, %v150_v10 }
  0xec   :  { %v162_v13 = vpop.f32.mrf.mxu0 }
  0xed   :  { %v151_v14 = vpack.c.bf16 %v112_v12, %v112_v12 }
  0xef   :  { %125 = vst.msk [vmem:[#allocation7 + $0x4] sm:$0xf] %vm123_vm2, %v151_v14 }
  0xf0   :  { %225 = shalt.err (!%p222_p0)
}
  0xf1   :  { %137 = dma.vmem_to_hbm [thread:$0]  %s132_s27, 128, %s290_s3, [#allocation4], %s244_s22, %s244_s22, %s245_s23  }
  0xf2   :  { %238 = dma.done.wait [#allocation4], 128  }
  0xf3   :  { %239 = vsyncadd [#allocation4], 4294967168 }
  0xf4   :  { %141 = vsyncpa [#allocation3], 1 }
  0xf5   :  { %142 = vsyncpa [#allocation6], 1 }
  0xf6   :  { %143 = vsyncpa [#allocation4], 1 }

</bundles_post_ra>
